<compile_context>
chip_gen: v6e
topology: v6e:2x2x1
jax: 0.10.0
libtpu: 0.0.40
codegen_flags: <defaults>
</compile_context>

<pallas_src>
import jax
import jax.numpy as jnp
from jax.experimental import pallas as pl
from jax.experimental.pallas import tpu as pltpu


def pooled_proj_kernel(x_ref, w_ref, o_ref):
    """Batched projection + L2 normalize of the pooled rows.

    x_ref : VMEM (Bp, tk)    bf16  -- pooled token embeddings, K-tile k
    w_ref : VMEM (tk, Hout)  bf16  -- stand-in weight for base.model, K-tile k
    o_ref : VMEM (Bp, Hout)  f32   -- accumulator / final normalized embeddings
    """
    k = pl.program_id(0)

    @pl.when(k == 0)
    def _init():
        o_ref[...] = jnp.zeros_like(o_ref)

    o_ref[...] += jnp.dot(x_ref[...], w_ref[...],
                          preferred_element_type=jnp.float32)

    @pl.when(k == pl.num_programs(0) - 1)
    def _finalize():
        acc = o_ref[...]                                        # (Bp, Hout)
        sumsq = jnp.sum(acc * acc, axis=1, keepdims=True)       # (Bp, 1)
        # torch F.normalize(p=2, dim=1): x / max(||x||, eps)  ==  x * rsqrt(max(sumsq, eps^2))
        inv = jax.lax.rsqrt(jnp.maximum(sumsq, jnp.float32(1e-24)))
        o_ref[...] = acc * inv


def _pick_k_tile(h):
    for t in (512, 256, 128):
        if h % t == 0:
            return t
    return h


def encoder_forward(input_ids, attention_mask, embed_table, w_hidden,
                    pooling_mask=None, normalize=True):
    """JAX wrapper reproducing Encoder.forward semantics (text-only path).

    input_ids      : (B, S) int32
    attention_mask : (B, S) int32   (right padding: processor.tokenizer.padding_side='right')
    embed_table    : (V, Hin)  f32  -- base.model.embed_tokens.weight
    w_hidden       : (Hin, Hout) f32 -- stand-in for base.model (per-token projection)
    returns        : (B, Hout) f32 pooled, L2-normalized embeddings
    """
    assert normalize, "module default normalize=True is what the kernel implements"
    B, S = input_ids.shape
    V, H_in = embed_table.shape
    H_out = w_hidden.shape[1]

    # ---- pooling index (scalar glue, matches PyTorch control flow) -------------------
    pooling_mask = attention_mask if pooling_mask is None else pooling_mask
    left_padding = jnp.sum(pooling_mask[:, -1]) == B
    sequence_lengths = jnp.sum(pooling_mask, axis=1).astype(jnp.int32) - 1
    idx = jnp.where(left_padding, S - 1, sequence_lengths).astype(jnp.int32)
    # all-zero mask -> index -1 in torch selects the last position; mirror that.
    idx = jnp.where(idx < 0, S - 1, idx)

    # ---- gather only the pooled tokens ------------------------------------------------
    # With the per-token projection stand-in, only these B rows ever reach the output,
    # so we never materialize the (B, S, Hin) inputs_embeds tensor.
    # TODO(synk): the real base.model is a full Qwen2-VL decoder (external module) which
    #             needs the whole sequence; the visual tower / pixel_values scatter is
    #             likewise external and not implemented (text-only path).
    pooled_ids = jnp.take_along_axis(input_ids, idx[:, None], axis=1)[:, 0]   # (B,)
    x_pooled = jnp.take(embed_table, pooled_ids, axis=0)                      # (B, Hin)

    # Pad batch to a sublane-friendly M and cast MXU inputs to bf16.
    Bp = max(8, ((B + 7) // 8) * 8)
    x_pad = jnp.pad(x_pooled, ((0, Bp - B), (0, 0)))
    x_bf = x_pad.astype(jnp.bfloat16)
    w_bf = w_hidden.astype(jnp.bfloat16)

    tk = _pick_k_tile(H_in)
    grid = (H_in // tk,)

    grid_spec = pltpu.PrefetchScalarGridSpec(
        num_scalar_prefetch=0,
        grid=grid,
        in_specs=[
            pl.BlockSpec((Bp, tk), lambda k: (0, k)),       # pooled activations, K-tiled
            pl.BlockSpec((tk, H_out), lambda k: (k, 0)),    # weight, K-tiled, full N (lane-dense out)
        ],
        out_specs=pl.BlockSpec((Bp, H_out), lambda k: (0, 0)),
    )

    cost = pl.CostEstimate(
        flops=2 * Bp * H_in * H_out,
        transcendentals=Bp,
        bytes_accessed=Bp * H_in * 2 + H_in * H_out * 2 + Bp * H_out * 4,
    )

    out = pl.pallas_call(
        pooled_proj_kernel,
        out_shape=jax.ShapeDtypeStruct((Bp, H_out), jnp.float32),
        grid_spec=grid_spec,
        compiler_params=pltpu.CompilerParams(
            dimension_semantics=("arbitrary",)),   # reduction axis
        cost_estimate=cost,
    )(x_bf, w_bf)

    return out[:B]


def encoder_forward_reference(input_ids, attention_mask, embed_table, w_hidden):
    """Pure-JAX reference mirroring the PyTorch forward (text-only path).

    Uses the same bf16-rounded MXU inputs (f32 accumulation) as the kernel so the
    comparison checks the kernel, not the bf16 cast.
    """
    B, S = input_ids.shape
    x = jnp.take(embed_table, input_ids, axis=0)
    x_bf = x.astype(jnp.bfloat16).astype(jnp.float32)
    w_bf = w_hidden.astype(jnp.bfloat16).astype(jnp.float32)
    h = jnp.dot(x_bf, w_bf)                                        # (B, S, Hout)
    left_padding = jnp.sum(attention_mask[:, -1]) == B
    seq_len = jnp.sum(attention_mask, axis=1) - 1
    idx = jnp.where(left_padding, S - 1, seq_len)
    idx = jnp.where(idx < 0, S - 1, idx)
    emb = h[jnp.arange(B), idx]
    return emb / jnp.maximum(
        jnp.linalg.norm(emb, axis=1, keepdims=True), 1e-12)


if __name__ == "__main__":
    B, S, H, V = 2, 8, 128, 64

    key = jax.random.PRNGKey(0)
    k_ids, k_emb, k_w = jax.random.split(key, 3)

    input_ids = jax.random.randint(k_ids, (B, S), 0, V, dtype=jnp.int32)
    # right padding (processor.tokenizer.padding_side = 'right'): lengths [8, 5]
    lengths = jnp.array([S, 5], dtype=jnp.int32)
    attention_mask = (jnp.arange(S)[None, :] < lengths[:, None]).astype(jnp.int32)

    embed_table = 0.02 * jax.random.normal(k_emb, (V, H), dtype=jnp.float32)
    w_hidden = 0.02 * jax.random.normal(k_w, (H, H), dtype=jnp.float32)

    out = encoder_forward(input_ids, attention_mask, embed_table, w_hidden)
    out = jax.block_until_ready(out)

    ref = encoder_forward_reference(input_ids, attention_mask, embed_table, w_hidden)
    assert out.shape == (B, H)
    assert jnp.allclose(out, ref, atol=1e-4, rtol=1e-4), "mismatch vs reference"

    print("KERNEL_OK")
</pallas_src>

<mosaic_0001>
module attributes {stable_mosaic.version = 11 : i64} {
  func.func @pooled_proj_kernel(%arg0: i32, %arg1: memref<8x128xbf16, #tpu.memory_space<vmem>>, %arg2: memref<128x128xbf16, #tpu.memory_space<vmem>>, %arg3: memref<8x128xf32, #tpu.memory_space<vmem>>) attributes {dimension_semantics = [#tpu.dimension_semantics<arbitrary>], iteration_bounds = array<i64: 1>, scalar_prefetch = 0 : i64, scratch_operands = 0 : i64, tpu.core_type = #tpu.core_type<tc>, window_params = [{transform_indices = @transform_0, window_bounds = array<i64: 8, 128>}, {transform_indices = @transform_1, window_bounds = array<i64: 128, 128>}, {pipeline_mode = #tpu.pipeline_mode<synchronous>, transform_indices = @transform_2, window_bounds = array<i64: 8, 128>}]} {
    %c0_i32 = arith.constant 0 : i32
    %0 = arith.cmpi eq, %arg0, %c0_i32 : i32
    %1 = arith.extui %0 : i1 to i32
    %c0_i32_0 = arith.constant 0 : i32
    %2 = arith.cmpi ne, %1, %c0_i32_0 : i32
    scf.if %2 {
      %cst_10 = arith.constant 0.000000e+00 : f32
      %12 = vector.broadcast %cst_10 : f32 to vector<8x128xf32>
      %c0_11 = arith.constant 0 : index
      %c0_12 = arith.constant 0 : index
      %13 = vector.load %arg3[%c0_11, %c0_12] : memref<8x128xf32, #tpu.memory_space<vmem>>, vector<8x128xf32>
      tpu.vector_store %arg3[%c0_11, %c0_12], %12 {strides = array<i32>} : memref<8x128xf32, #tpu.memory_space<vmem>>, vector<8x128xf32>,
    } else {
    }
    %c0 = arith.constant 0 : index
    %c0_1 = arith.constant 0 : index
    %3 = vector.load %arg3[%c0, %c0_1] : memref<8x128xf32, #tpu.memory_space<vmem>>, vector<8x128xf32>
    %c0_2 = arith.constant 0 : index
    %c0_3 = arith.constant 0 : index
    %4 = vector.load %arg1[%c0_2, %c0_3] : memref<8x128xbf16, #tpu.memory_space<vmem>>, vector<8x128xbf16>
    %c0_4 = arith.constant 0 : index
    %c0_5 = arith.constant 0 : index
    %5 = vector.load %arg2[%c0_4, %c0_5] : memref<128x128xbf16, #tpu.memory_space<vmem>>, vector<128x128xbf16>
    %cst = arith.constant dense<0.000000e+00> : vector<8x128xf32>
    %6 = tpu.matmul %4, %5, %cst {dimension_numbers = #tpu.dot_dimension_numbers<[1], [0], [0], [1], [0, 0, 1, 1], [], []>} : vector<8x128xbf16>, vector<128x128xbf16>, vector<8x128xf32> -> vector<8x128xf32>
    %7 = arith.addf %3, %6 : vector<8x128xf32>
    %c0_6 = arith.constant 0 : index
    %c0_7 = arith.constant 0 : index
    %8 = vector.load %arg3[%c0_6, %c0_7] : memref<8x128xf32, #tpu.memory_space<vmem>>, vector<8x128xf32>
    tpu.vector_store %arg3[%c0_6, %c0_7], %7 {strides = array<i32>} : memref<8x128xf32, #tpu.memory_space<vmem>>, vector<8x128xf32>,
    %c0_i32_8 = arith.constant 0 : i32
    %9 = arith.cmpi eq, %arg0, %c0_i32_8 : i32
    %10 = arith.extui %9 : i1 to i32
    %c0_i32_9 = arith.constant 0 : i32
    %11 = arith.cmpi ne, %10, %c0_i32_9 : i32
    scf.if %11 {
      %c0_10 = arith.constant 0 : index
      %c0_11 = arith.constant 0 : index
      %12 = vector.load %arg3[%c0_10, %c0_11] : memref<8x128xf32, #tpu.memory_space<vmem>>, vector<8x128xf32>
      %13 = arith.mulf %12, %12 : vector<8x128xf32>
      %cst_12 = arith.constant dense<0.000000e+00> : vector<8xf32>
      %14 = vector.multi_reduction <add>, %13, %cst_12 [1] : vector<8x128xf32> to vector<8xf32>
      %15 = vector.shape_cast %14 : vector<8xf32> to vector<8x1xf32>
      %cst_13 = arith.constant 1.000000e-24 : f32
      %16 = vector.broadcast %cst_13 : f32 to vector<8x1xf32>
      %17 = arith.maximumf %15, %16 : vector<8x1xf32>
      %18 = math.rsqrt %17 : vector<8x1xf32>
      %19 = vector.broadcast %18 : vector<8x1xf32> to vector<8x128xf32>
      %20 = arith.mulf %12, %19 : vector<8x128xf32>
      %c0_14 = arith.constant 0 : index
      %c0_15 = arith.constant 0 : index
      %21 = vector.load %arg3[%c0_14, %c0_15] : memref<8x128xf32, #tpu.memory_space<vmem>>, vector<8x128xf32>
      tpu.vector_store %arg3[%c0_14, %c0_15], %20 {strides = array<i32>} : memref<8x128xf32, #tpu.memory_space<vmem>>, vector<8x128xf32>,
    } else {
    }
    return
  }
  func.func @transform_0(%arg0: i32) -> (i32, i32) {
    %c0_i32 = arith.constant 0 : i32
    %c0_i32_0 = arith.constant 0 : i32
    return %c0_i32, %arg0 : i32, i32
  }
  func.func @transform_1(%arg0: i32) -> (i32, i32) {
    %c0_i32 = arith.constant 0 : i32
    %c0_i32_0 = arith.constant 0 : i32
    return %arg0, %c0_i32 : i32, i32
  }
  func.func @transform_2(%arg0: i32) -> (i32, i32) {
    %c0_i32 = arith.constant 0 : i32
    %c0_i32_0 = arith.constant 0 : i32
    %c0_i32_1 = arith.constant 0 : i32
    return %c0_i32, %c0_i32_0 : i32, i32
  }
}

</mosaic_0001>

<bundles_post_ra>
// kernel: tpu_custom_call.1
= control target key start
LH: loop header
LB: loop body
LE: loop exit
PB: predicated region body
PF: predicated region fallthrough
CT: control target
= control target key end

     0   :  { %7 = vsyncpa [#allocation3], 0  ;;  %s330_s0 = inlined_call_operand.hbm [shape: bf16[8,128], index: 0, kind: input, shape index: {}]   ;;  %s331_s1 = inlined_call_operand.hbm [shape: bf16[128,128], index: 1, kind: input, shape index: {}]   ;;  %s332_s2 = inlined_call_operand.hbm [shape: f32[8,128], index: 2, kind: output, shape index: {}]  }
   0x1   :  { %8 = vsyncpa [#allocation6], 0 }
   0x2   :  { %9 = vsyncpa [#allocation4], 0  ;;  %s299_s9 = smov [#allocation2]   ;;  %s300_s11 = smov [#allocation5]  }
   0x3   :  { %s16_s10 = sshll.u32 %s299_s9, 4  ;;  %s25_s12 = sshll.u32 %s300_s11, 4  ;;  %s17_s10 = int_to_ptr.vmem [resolvable:$true] %s16_s10  ;;  %s26_s12 = int_to_ptr.vmem [resolvable:$true] %s25_s12 }
   0x4   :  { %s241_s13 = scalar_lea.vmem %s17_s10, 64  ;;  %p246_p1 = scmp.lt.s32.totalorder %s17_s10, %s17_s10 }
   0x5   :  { %p242_p0 = scmp.ne.s32.totalorder %s17_s10, %s241_s13  ;;  %p247_p2 = scmp.lt.s32.totalorder %s241_s13, %s241_s13 }
   0x7   :  { %p248_p3 = por %p247_p2, %p246_p1 }
   0x9   :  { %p249_p4 = pnand %p248_p3, %p242_p0 }
   0xb   :  { %252 = shalt.err (!%p249_p4)
}
   0xc   :  { %19 = dma.hbm_to_vmem [thread:$0]  %s330_s0, 64, %s17_s10, [#allocation3]  }
   0xd   :  { %s261_s16 = scalar_lea.vmem %s26_s12, 1024  ;;  %p266_p6 = scmp.lt.s32.totalorder %s26_s12, %s26_s12 }
   0xe   :  { %p262_p5 = scmp.ne.s32.totalorder %s26_s12, %s261_s16  ;;  %p267_p7 = scmp.lt.s32.totalorder %s261_s16, %s261_s16 }
  0x10   :  { %p268_p8 = por %p267_p7, %p266_p6 }
  0x12   :  { %p269_p9 = pnand %p268_p8, %p262_p5 }
  0x14   :  { %272 = shalt.err (!%p269_p9)
}
  0x15   :  { %s301_s17 = smov 64   ;;  %s302_s18 = smov 4  }
  0x16   :  { %31 = dma.hbm_to_vmem [thread:$0]  %s331_s1, 1024, %s26_s12, [#allocation6], %s301_s17, %s301_s17, %s302_s18  }
  0x17   :  { %293 = dma.done.wait [#allocation3], 64  }
  0x18   :  { %294 = vsyncadd [#allocation3], 4294967232 }
  0x19   :  { %295 = dma.done.wait [#allocation6], 1024  }
  0x1a   :  { %296 = vsyncadd [#allocation6], 4294966272  ;;  %v303_v0 = vmov 0.0   ;;  %vm304_vm0 = vmmov 0   ;;  %v223_v1 = vld [vmem:[#allocation5 + $0x38] sm:$0xff]   ;;  %v224_v2 = vld [vmem:[#allocation5 + $0x30] sm:$0xff]  }
  0x1b   :  { %196 = vmatprep.subr.bf16.mxu0 %v303_v0  ;;  %212 = vmatprep.mubr.msk.bf16.mxu0 %vm304_vm0, %v303_v0  ;;  %v225_v3 = vld [vmem:[#allocation5 + $0x28] sm:$0xff]   ;;  %v226_v4 = vld [vmem:[#allocation5 + $0x20] sm:$0xff]   ;;  %v227_v5 = vld [vmem:[#allocation5 + $0x18] sm:$0xff]   ;;  %s305_s0 = smov [#allocation7]  }
  0x1c   :  { %197 = vmatpush3.bf16.msra.mxu0 %v223_v1  ;;  %v228_v6 = vld [vmem:[#allocation5 + $0x10] sm:$0xff]   ;;  %v229_v7 = vld [vmem:[#allocation5 + $0x8] sm:$0xff]   ;;  %v230_v8 = vld [vmem:[#allocation5] sm:$0xff]   ;;  %s169_s1 = sshll.u32 %s305_s0, 4  ;;  %s170_s1 = int_to_ptr.vmem [resolvable:$true] %s169_s1 }
  0x1d   :  { %198 = vmatprep.subr.bf16.mxu0 %v303_v0  ;;  %v45_v9 = vld [vmem:[#allocation2] sm:$0xf]  ;;  %s273_s21 = scalar_lea.vmem %s170_s1, 128  ;;  %p278_p11 = scmp.lt.s32.totalorder %s170_s1, %s170_s1 }
  0x1e   :  { %p274_p10 = scmp.ne.s32.totalorder %s170_s1, %s273_s21  ;;  %p279_p12 = scmp.lt.s32.totalorder %s273_s21, %s273_s21 }
  0x20   :  { %199 = vmatpush3.bf16.msra.mxu0 %v224_v2  ;;  %p280_p13 = por %p279_p12, %p278_p11 }
  0x21   :  { %200 = vmatprep.subr.bf16.mxu0 %v303_v0 }
  0x22   :  { %p281_p0 = pnand %p280_p13, %p274_p10 }
  0x24   :  { %201 = vmatpush3.bf16.msra.mxu0 %v225_v3 }
  0x25   :  { %202 = vmatprep.subr.bf16.mxu0 %v303_v0 }
  0x28   :  { %203 = vmatpush3.bf16.msra.mxu0 %v226_v4 }
  0x29   :  { %204 = vmatprep.subr.bf16.mxu0 %v303_v0 }
  0x2c   :  { %205 = vmatpush3.bf16.msra.mxu0 %v227_v5 }
  0x2d   :  { %206 = vmatprep.subr.bf16.mxu0 %v303_v0 }
  0x30   :  { %207 = vmatpush3.bf16.msra.mxu0 %v228_v6 }
  0x31   :  { %208 = vmatprep.subr.bf16.mxu0 %v303_v0 }
  0x34   :  { %209 = vmatpush3.bf16.msra.mxu0 %v229_v7 }
  0x35   :  { %210 = vmatprep.subr.bf16.mxu0 %v303_v0 }
  0x38   :  { %211 = vmatpush3.bf16.msra.mxu0 %v230_v8 }
  0x3b   :  { %213 = vmatmul.mubr.bf16.vlgmr.msra.gmra.mxu0 %v45_v9 }
  0xfb   :  { %v144_v10 = vpop.f32.mrf.mxu0 }
  0xfc   :  { %v156_v12 = vmul.f32 %v144_v10, %v144_v10 }
  0xfd   :  { %v214_v11 = vpop.f32.mrf.mxu0 }
  0xfe   :  { %157 = vadd.xlane.f32.xlu0 %v156_v12 }
  0xff   :  { %v147_v13 = vpop.f32.mrf.mxu0 }
 0x101   :  { %v215_v14 = vpop.f32.mrf.mxu0 }
 0x187   :  { %v158_v15 = vpop.xlane.xlu0 %157 }
 0x188   :  { %v159_v16 = vmax.f32 %v158_v15, 1e-24 }
 0x18a   :  { %231 = vrsqrt.f32 %v159_v16 }
 0x197   :  { %v232_v17 = vpop.eup %231 }
 0x198   :  { %v161_v18 = vmul.f32 %v232_v17, %v144_v10 }
 0x19a   :  { %162 = vst [vmem:[#allocation7] sm:$0xff] %v161_v18 }
 0x19b   :  { %284 = shalt.err (!%p281_p0)
}
 0x19c   :  { %172 = dma.vmem_to_hbm [thread:$0]  %s170_s1, 128, %s332_s2, [#allocation4]  }
 0x19d   :  { %297 = dma.done.wait [#allocation4], 128  }
 0x19e   :  { %298 = vsyncadd [#allocation4], 4294967168 }
 0x19f   :  { %176 = vsyncpa [#allocation3], 1 }
 0x1a0   :  { %177 = vsyncpa [#allocation6], 1 }
 0x1a1   :  { %178 = vsyncpa [#allocation4], 1 }

</bundles_post_ra>
